<compile_context>
chip_gen: v7x
topology: tpu7x:2x2x1
jax: 0.10.0
libtpu: 0.0.40
codegen_flags: <defaults>
</compile_context>

<pallas_src>
import jax
import jax.numpy as jnp
from jax.experimental import pallas as pl
from jax.experimental.pallas import tpu as pltpu

EPS = 1e-5  # nn.LayerNorm default eps


def _layer_norm(x, w, b):
    mu = jnp.mean(x, axis=-1, keepdims=True)
    xc = x - mu
    var = jnp.mean(xc * xc, axis=-1, keepdims=True)
    return xc * jax.lax.rsqrt(var + EPS) * w + b


def _gelu_exact(x):
    # nn.GELU() default (erf-based, not tanh approximation)
    return 0.5 * x * (1.0 + jax.lax.erf(x * jnp.float32(0.7071067811865476)))


def mlp_block_kernel(x_ref, wT_ref,
                     n1w_ref, n1b_ref, g1_ref,
                     n2w_ref, n2b_ref, g2_ref,
                     fc1w_ref, fc1b_ref, fc2w_ref, fc2b_ref,
                     o_ref):
    Bt, N, C = x_ref.shape

    x3 = x_ref[...]                                            # (Bt, N, C) f32

    # ---- branch 1: LN1 -> token mixing (softmax + transpose hoisted to wrapper) ----
    h1 = _layer_norm(x3, n1w_ref[...], n1b_ref[...]).astype(jnp.bfloat16)   # (Bt, N, C)
    # Single batched MXU contraction over the source-token axis:
    #   mixed[b, m, c] = sum_n wT[m, n] * h1[b, n, c]
    wT_b = jnp.broadcast_to(wT_ref[...], (Bt, N, N))           # bf16, hoisted once
    mixed = jax.lax.dot_general(
        wT_b, h1,
        dimension_numbers=(((2,), (1,)), ((0,), (0,))),
        preferred_element_type=jnp.float32)                    # (Bt, N, C) f32
    # TODO(synk): for lane-aligned production C (multiple of 128), fold Bt into
    # the MXU output columns with one (N, N) @ (N, Bt*C) push (sublane-only
    # transpose of h1) to fill the 256-wide output dim on v6e/v7x.
    x1 = x3 + g1_ref[...] * mixed                              # (Bt, N, C) f32

    # ---- branch 2: LN2 -> fc1 -> GELU -> fc2, fused over all Bt*N rows ----
    x1_2d = x1.reshape(Bt * N, C)                              # leading-dim collapse (free)
    h2 = _layer_norm(x1_2d, n2w_ref[...], n2b_ref[...]).astype(jnp.bfloat16)
    hid = _gelu_exact(
        jnp.dot(h2, fc1w_ref[...], preferred_element_type=jnp.float32) + fc1b_ref[...])
    mlp_out = jnp.dot(hid.astype(jnp.bfloat16), fc2w_ref[...],
                      preferred_element_type=jnp.float32) + fc2b_ref[...]
    y = x1_2d + g2_ref[...] * mlp_out                          # (Bt*N, C) f32

    o_ref[...] = y.reshape(Bt, N, C).astype(o_ref.dtype)


def _vmem_capacity_bytes():
    """Chip-aware VMEM capacity (falls back to 128 MiB if the query fails)."""
    try:
        info = pltpu.get_tpu_info()
        return int(getattr(info, "vmem_capacity_bytes", 128 << 20))
    except Exception:
        return 128 << 20


def _pick_bt(B, N, C, H, budget, min_steps):
    """Largest batch tile dividing B whose per-step working set fits the budget
    and that leaves at least `min_steps` grid steps (>=2 on 2-TC v7x parts)."""
    best = 1
    for bt in range(1, B + 1):
        if B % bt:
            continue
        if B // bt < min(min_steps, B):
            continue
        work = (4 * bt * N * C * 4              # double-buffered f32 in/out tiles
                + bt * N * (8 * C + 2 * H) * 4  # f32 intermediates (upper bound)
                + bt * N * N * 2)               # broadcast bf16 mixing weight
        if work <= budget:
            best = bt
    return best


def mlp_block(x, p, block_batch=None):
    B, N, C = x.shape
    H = p["fc1_w"].shape[1]

    vmem_cap = _vmem_capacity_bytes()
    small_vmem = vmem_cap <= 72 * (1 << 20)           # v7x-like: 64 MiB / TC, 2 TCs
    min_steps = 2 if small_vmem else 1                # keep both v7x cores busy
    tile_budget = (20 << 20) if small_vmem else (48 << 20)
    limit_cap = (40 << 20) if small_vmem else (64 << 20)

    Bt = block_batch or _pick_bt(B, N, C, H, tile_budget, min_steps)
    assert B % Bt == 0

    # Parameter-only preprocessing hoisted out of the kernel:
    #   softmax over the source-token axis (torch dim=1 of (heads, n, n) ==
    #   axis 0 of the (N, N) slice), then transpose so the kernel contraction
    #   is a plain dot, plus bf16 casts of the matmul weights (halves weight
    #   DMA, full-rate MXU; f32 accumulation in-kernel).
    wT = jax.nn.softmax(p["spatial_w"][0], axis=0).T.astype(jnp.bfloat16)   # (N, N)
    fc1w = p["fc1_w"].astype(jnp.bfloat16)                                  # (C, H)
    fc2w = p["fc2_w"].astype(jnp.bfloat16)                                  # (H, C)

    # Conservative per-step VMEM estimate (counts weight double-buffering even
    # though Buffered(1) is requested, so the limit is never underestimated).
    est_bytes = (4 * Bt * N * C * 4
                 + Bt * N * (8 * C + 2 * H) * 4
                 + Bt * N * N * 2
                 + 2 * (2 * (N * N + C * H + H * C) + 4 * (6 * C + 2 * H)))
    vmem_limit = None
    if est_bytes > 12 * (1 << 20):
        vmem_limit = int(min(2 * est_bytes, limit_cap))

    # Advisory cost estimate so XLA can overlap the kernel with neighbors.
    cost = pl.CostEstimate(
        flops=2 * B * N * (N * C + C * H + H * C),
        transcendentals=B * N * H,                       # one erf per hidden element
        bytes_accessed=2 * B * N * C * 4 + 2 * (N * N + C * H + H * C) + 4 * (6 * C + 2 * H))

    args = (x, wT,
            p["n1_w"], p["n1_b"], p["gamma1"],
            p["n2_w"], p["n2_b"], p["gamma2"],
            fc1w, p["fc1_b"], fc2w, p["fc2_b"])

    def build(single_buffer_consts):
        def const(shape):
            # Whole-array block, constant across the grid -> fetched once.
            kwargs = {}
            if single_buffer_consts and hasattr(pl, "Buffered"):
                kwargs["pipeline_mode"] = pl.Buffered(1)
            return pl.BlockSpec(shape, lambda b: (0,) * len(shape), **kwargs)

        return pl.pallas_call(
            mlp_block_kernel,
            out_shape=jax.ShapeDtypeStruct((B, N, C), x.dtype),
            grid_spec=pltpu.PrefetchScalarGridSpec(
                num_scalar_prefetch=0,
                grid=(B // Bt,),
                in_specs=[
                    pl.BlockSpec((Bt, N, C), lambda b: (b, 0, 0)),   # x (batch tile)
                    const((N, N)),                                   # softmax'd + transposed mixing weight (bf16)
                    const((1, C)), const((1, C)), const((1, C)),     # norm1 w/b, gamma1
                    const((1, C)), const((1, C)), const((1, C)),     # norm2 w/b, gamma2
                    const((C, H)), const((1, H)),                    # fc1 (bf16, (in,out)), b1
                    const((H, C)), const((1, C)),                    # fc2 (bf16, (in,out)), b2
                ],
                out_specs=pl.BlockSpec((Bt, N, C), lambda b: (b, 0, 0)),
            ),
            compiler_params=pltpu.CompilerParams(
                dimension_semantics=("parallel",),
                vmem_limit_bytes=vmem_limit),
            cost_estimate=cost,
        )

    try:
        return build(True)(*args)
    except Exception:
        # Single-buffered constant blocks unsupported on this jax version:
        # fall back to default double-buffering (costs ~2x constant-weight VMEM).
        return build(False)(*args)


def mlp_block_ref(x, p):
    # pure-JAX f32 reference for correctness checking
    h1 = _layer_norm(x, p["n1_w"][0], p["n1_b"][0])
    w = jax.nn.softmax(p["spatial_w"][0], axis=0)          # (N, N)
    mixed = jnp.einsum("bnc,nm->bmc", h1, w)
    x1 = x + p["gamma1"][0] * mixed
    h2 = _layer_norm(x1, p["n2_w"][0], p["n2_b"][0])
    hid = _gelu_exact(h2 @ p["fc1_w"] + p["fc1_b"][0])
    out = hid @ p["fc2_w"] + p["fc2_b"][0]
    return x1 + p["gamma2"][0] * out


def make_params(key, dim, n, hidden, init_values=1e-5):
    ks = jax.random.split(key, 5)
    f32 = jnp.float32
    return {
        # SpatialMLP weight bank: torch.randn(num_heads, n, n) * 0.02, num_heads=1
        "spatial_w": 0.02 * jax.random.normal(ks[0], (1, n, n), f32),
        # LayerNorm defaults: weight=1, bias=0
        "n1_w": jnp.ones((1, dim), f32), "n1_b": jnp.zeros((1, dim), f32),
        "n2_w": jnp.ones((1, dim), f32), "n2_b": jnp.zeros((1, dim), f32),
        # layer-scale gammas
        "gamma1": jnp.full((1, dim), init_values, f32),
        "gamma2": jnp.full((1, dim), init_values, f32),
        # Mlp linears, stored pre-transposed as (in, out) so kernel does x @ W + b
        "fc1_w": 0.02 * jax.random.normal(ks[1], (dim, hidden), f32),
        "fc1_b": 0.01 * jax.random.normal(ks[2], (1, hidden), f32),
        "fc2_w": 0.02 * jax.random.normal(ks[3], (hidden, dim), f32),
        "fc2_b": 0.01 * jax.random.normal(ks[4], (1, dim), f32),
    }


if __name__ == "__main__":
    B, N, C = 2, 16, 32              # batch, tokens (n), dim
    hidden = int(C * 4.0)            # mlp_ratio = 4.0

    key = jax.random.PRNGKey(0)
    kx, kp = jax.random.split(key)
    x = jax.random.normal(kx, (B, N, C), jnp.float32)
    params = make_params(kp, C, N, hidden)

    out = jax.block_until_ready(mlp_block(x, params))
    ref = jax.block_until_ready(mlp_block_ref(x, params))

    assert out.shape == (B, N, C)
    assert jnp.allclose(out, ref, atol=1e-4, rtol=1e-4), \
        f"max abs err = {jnp.max(jnp.abs(out - ref))}"
    print("KERNEL_OK")
</pallas_src>

<mosaic_0001>
module attributes {stable_mosaic.version = 11 : i64} {
  func.func @mlp_block_kernel(%arg0: i32, %arg1: memref<2x16x32xf32, #tpu.memory_space<vmem>>, %arg2: memref<16x16xbf16, #tpu.memory_space<vmem>>, %arg3: memref<1x32xf32, #tpu.memory_space<vmem>>, %arg4: memref<1x32xf32, #tpu.memory_space<vmem>>, %arg5: memref<1x32xf32, #tpu.memory_space<vmem>>, %arg6: memref<1x32xf32, #tpu.memory_space<vmem>>, %arg7: memref<1x32xf32, #tpu.memory_space<vmem>>, %arg8: memref<1x32xf32, #tpu.memory_space<vmem>>, %arg9: memref<32x128xbf16, #tpu.memory_space<vmem>>, %arg10: memref<1x128xf32, #tpu.memory_space<vmem>>, %arg11: memref<128x32xbf16, #tpu.memory_space<vmem>>, %arg12: memref<1x32xf32, #tpu.memory_space<vmem>>, %arg13: memref<2x16x32xf32, #tpu.memory_space<vmem>>) attributes {dimension_semantics = [#tpu.dimension_semantics<parallel>], iteration_bounds = array<i64: 1>, scalar_prefetch = 0 : i64, scratch_operands = 0 : i64, tpu.core_type = #tpu.core_type<tc>, window_params = [{transform_indices = @transform_0, window_bounds = array<i64: 2, 16, 32>}, {pipeline_mode = #tpu.pipeline_mode<synchronous>, transform_indices = @transform_1, window_bounds = array<i64: 16, 16>}, {pipeline_mode = #tpu.pipeline_mode<synchronous>, transform_indices = @transform_2, window_bounds = array<i64: 1, 32>}, {pipeline_mode = #tpu.pipeline_mode<synchronous>, transform_indices = @transform_3, window_bounds = array<i64: 1, 32>}, {pipeline_mode = #tpu.pipeline_mode<synchronous>, transform_indices = @transform_4, window_bounds = array<i64: 1, 32>}, {pipeline_mode = #tpu.pipeline_mode<synchronous>, transform_indices = @transform_5, window_bounds = array<i64: 1, 32>}, {pipeline_mode = #tpu.pipeline_mode<synchronous>, transform_indices = @transform_6, window_bounds = array<i64: 1, 32>}, {pipeline_mode = #tpu.pipeline_mode<synchronous>, transform_indices = @transform_7, window_bounds = array<i64: 1, 32>}, {pipeline_mode = #tpu.pipeline_mode<synchronous>, transform_indices = @transform_8, window_bounds = array<i64: 32, 128>}, {pipeline_mode = #tpu.pipeline_mode<synchronous>, transform_indices = @transform_9, window_bounds = array<i64: 1, 128>}, {pipeline_mode = #tpu.pipeline_mode<synchronous>, transform_indices = @transform_10, window_bounds = array<i64: 128, 32>}, {pipeline_mode = #tpu.pipeline_mode<synchronous>, transform_indices = @transform_11, window_bounds = array<i64: 1, 32>}, {transform_indices = @transform_12, window_bounds = array<i64: 2, 16, 32>}]} {
    %c0 = arith.constant 0 : index
    %c0_0 = arith.constant 0 : index
    %c0_1 = arith.constant 0 : index
    %0 = vector.load %arg1[%c0, %c0_0, %c0_1] : memref<2x16x32xf32, #tpu.memory_space<vmem>>, vector<2x16x32xf32>
    %c0_2 = arith.constant 0 : index
    %c0_3 = arith.constant 0 : index
    %1 = vector.load %arg3[%c0_2, %c0_3] : memref<1x32xf32, #tpu.memory_space<vmem>>, vector<1x32xf32>
    %c0_4 = arith.constant 0 : index
    %c0_5 = arith.constant 0 : index
    %2 = vector.load %arg4[%c0_4, %c0_5] : memref<1x32xf32, #tpu.memory_space<vmem>>, vector<1x32xf32>
    %cst = arith.constant dense<0.000000e+00> : vector<2x16xf32>
    %3 = vector.multi_reduction <add>, %0, %cst [2] : vector<2x16x32xf32> to vector<2x16xf32>
    %4 = vector.shape_cast %3 : vector<2x16xf32> to vector<2x16x1xf32>
    %cst_6 = arith.constant 3.200000e+01 : f32
    %5 = vector.broadcast %cst_6 : f32 to vector<2x16x1xf32>
    %6 = arith.divf %4, %5 : vector<2x16x1xf32>
    %7 = vector.broadcast %6 : vector<2x16x1xf32> to vector<2x16x32xf32>
    %8 = arith.subf %0, %7 : vector<2x16x32xf32>
    %9 = arith.mulf %8, %8 : vector<2x16x32xf32>
    %cst_7 = arith.constant dense<0.000000e+00> : vector<2x16xf32>
    %10 = vector.multi_reduction <add>, %9, %cst_7 [2] : vector<2x16x32xf32> to vector<2x16xf32>
    %11 = vector.shape_cast %10 : vector<2x16xf32> to vector<2x16x1xf32>
    %cst_8 = arith.constant 3.200000e+01 : f32
    %12 = vector.broadcast %cst_8 : f32 to vector<2x16x1xf32>
    %13 = arith.divf %11, %12 : vector<2x16x1xf32>
    %cst_9 = arith.constant 9.99999974E-6 : f32
    %14 = vector.broadcast %cst_9 : f32 to vector<2x16x1xf32>
    %15 = arith.addf %13, %14 : vector<2x16x1xf32>
    %16 = math.rsqrt %15 : vector<2x16x1xf32>
    %17 = vector.broadcast %16 : vector<2x16x1xf32> to vector<2x16x32xf32>
    %18 = arith.mulf %8, %17 : vector<2x16x32xf32>
    %19 = vector.shape_cast %1 : vector<1x32xf32> to vector<1x1x32xf32>
    %20 = vector.broadcast %19 : vector<1x1x32xf32> to vector<2x16x32xf32>
    %21 = arith.mulf %18, %20 : vector<2x16x32xf32>
    %22 = vector.shape_cast %2 : vector<1x32xf32> to vector<1x1x32xf32>
    %23 = vector.broadcast %22 : vector<1x1x32xf32> to vector<2x16x32xf32>
    %24 = arith.addf %21, %23 : vector<2x16x32xf32>
    %25 = arith.truncf %24 : vector<2x16x32xf32> to vector<2x16x32xbf16>
    %c0_10 = arith.constant 0 : index
    %c0_11 = arith.constant 0 : index
    %26 = vector.load %arg2[%c0_10, %c0_11] : memref<16x16xbf16, #tpu.memory_space<vmem>>, vector<16x16xbf16>
    %27 = vector.shape_cast %26 : vector<16x16xbf16> to vector<1x16x16xbf16>
    %28 = vector.broadcast %27 : vector<1x16x16xbf16> to vector<2x16x16xbf16>
    %cst_12 = arith.constant dense<0.000000e+00> : vector<2x16x32xf32>
    %29 = tpu.matmul %28, %25, %cst_12 {dimension_numbers = #tpu.dot_dimension_numbers<[2], [1], [1], [2], [0, 0, 0, 1, 1, 2], [0], [0]>} : vector<2x16x16xbf16>, vector<2x16x32xbf16>, vector<2x16x32xf32> -> vector<2x16x32xf32>
    %c0_13 = arith.constant 0 : index
    %c0_14 = arith.constant 0 : index
    %30 = vector.load %arg5[%c0_13, %c0_14] : memref<1x32xf32, #tpu.memory_space<vmem>>, vector<1x32xf32>
    %31 = vector.shape_cast %30 : vector<1x32xf32> to vector<1x1x32xf32>
    %32 = vector.broadcast %31 : vector<1x1x32xf32> to vector<2x16x32xf32>
    %33 = arith.mulf %32, %29 : vector<2x16x32xf32>
    %34 = arith.addf %0, %33 : vector<2x16x32xf32>
    %35 = vector.shape_cast %34 : vector<2x16x32xf32> to vector<32x32xf32>
    %c0_15 = arith.constant 0 : index
    %c0_16 = arith.constant 0 : index
    %36 = vector.load %arg6[%c0_15, %c0_16] : memref<1x32xf32, #tpu.memory_space<vmem>>, vector<1x32xf32>
    %c0_17 = arith.constant 0 : index
    %c0_18 = arith.constant 0 : index
    %37 = vector.load %arg7[%c0_17, %c0_18] : memref<1x32xf32, #tpu.memory_space<vmem>>, vector<1x32xf32>
    %cst_19 = arith.constant dense<0.000000e+00> : vector<32xf32>
    %38 = vector.multi_reduction <add>, %35, %cst_19 [1] : vector<32x32xf32> to vector<32xf32>
    %39 = vector.shape_cast %38 : vector<32xf32> to vector<32x1xf32>
    %cst_20 = arith.constant 3.200000e+01 : f32
    %40 = vector.broadcast %cst_20 : f32 to vector<32x1xf32>
    %41 = arith.divf %39, %40 : vector<32x1xf32>
    %42 = vector.broadcast %41 : vector<32x1xf32> to vector<32x32xf32>
    %43 = arith.subf %35, %42 : vector<32x32xf32>
    %44 = arith.mulf %43, %43 : vector<32x32xf32>
    %cst_21 = arith.constant dense<0.000000e+00> : vector<32xf32>
    %45 = vector.multi_reduction <add>, %44, %cst_21 [1] : vector<32x32xf32> to vector<32xf32>
    %46 = vector.shape_cast %45 : vector<32xf32> to vector<32x1xf32>
    %cst_22 = arith.constant 3.200000e+01 : f32
    %47 = vector.broadcast %cst_22 : f32 to vector<32x1xf32>
    %48 = arith.divf %46, %47 : vector<32x1xf32>
    %cst_23 = arith.constant 9.99999974E-6 : f32
    %49 = vector.broadcast %cst_23 : f32 to vector<32x1xf32>
    %50 = arith.addf %48, %49 : vector<32x1xf32>
    %51 = math.rsqrt %50 : vector<32x1xf32>
    %52 = vector.broadcast %51 : vector<32x1xf32> to vector<32x32xf32>
    %53 = arith.mulf %43, %52 : vector<32x32xf32>
    %54 = vector.broadcast %36 : vector<1x32xf32> to vector<32x32xf32>
    %55 = arith.mulf %53, %54 : vector<32x32xf32>
    %56 = vector.broadcast %37 : vector<1x32xf32> to vector<32x32xf32>
    %57 = arith.addf %55, %56 : vector<32x32xf32>
    %58 = arith.truncf %57 : vector<32x32xf32> to vector<32x32xbf16>
    %c0_24 = arith.constant 0 : index
    %c0_25 = arith.constant 0 : index
    %59 = vector.load %arg9[%c0_24, %c0_25] : memref<32x128xbf16, #tpu.memory_space<vmem>>, vector<32x128xbf16>
    %cst_26 = arith.constant dense<0.000000e+00> : vector<32x128xf32>
    %60 = tpu.matmul %58, %59, %cst_26 {dimension_numbers = #tpu.dot_dimension_numbers<[1], [0], [0], [1], [0, 0, 1, 1], [], []>} : vector<32x32xbf16>, vector<32x128xbf16>, vector<32x128xf32> -> vector<32x128xf32>
    %c0_27 = arith.constant 0 : index
    %c0_28 = arith.constant 0 : index
    %61 = vector.load %arg10[%c0_27, %c0_28] : memref<1x128xf32, #tpu.memory_space<vmem>>, vector<1x128xf32>
    %62 = vector.broadcast %61 : vector<1x128xf32> to vector<32x128xf32>
    %63 = arith.addf %60, %62 : vector<32x128xf32>
    %cst_29 = arith.constant 5.000000e-01 : f32
    %64 = vector.broadcast %cst_29 : f32 to vector<32x128xf32>
    %65 = arith.mulf %64, %63 : vector<32x128xf32>
    %cst_30 = arith.constant 0.707106769 : f32
    %66 = vector.broadcast %cst_30 : f32 to vector<32x128xf32>
    %67 = arith.mulf %63, %66 : vector<32x128xf32>
    %68 = math.erf %67 : vector<32x128xf32>
    %cst_31 = arith.constant 1.000000e+00 : f32
    %69 = vector.broadcast %cst_31 : f32 to vector<32x128xf32>
    %70 = arith.addf %69, %68 : vector<32x128xf32>
    %71 = arith.mulf %65, %70 : vector<32x128xf32>
    %72 = arith.truncf %71 : vector<32x128xf32> to vector<32x128xbf16>
    %c0_32 = arith.constant 0 : index
    %c0_33 = arith.constant 0 : index
    %73 = vector.load %arg11[%c0_32, %c0_33] : memref<128x32xbf16, #tpu.memory_space<vmem>>, vector<128x32xbf16>
    %cst_34 = arith.constant dense<0.000000e+00> : vector<32x32xf32>
    %74 = tpu.matmul %72, %73, %cst_34 {dimension_numbers = #tpu.dot_dimension_numbers<[1], [0], [0], [1], [0, 0, 1, 1], [], []>} : vector<32x128xbf16>, vector<128x32xbf16>, vector<32x32xf32> -> vector<32x32xf32>
    %c0_35 = arith.constant 0 : index
    %c0_36 = arith.constant 0 : index
    %75 = vector.load %arg12[%c0_35, %c0_36] : memref<1x32xf32, #tpu.memory_space<vmem>>, vector<1x32xf32>
    %76 = vector.broadcast %75 : vector<1x32xf32> to vector<32x32xf32>
    %77 = arith.addf %74, %76 : vector<32x32xf32>
    %c0_37 = arith.constant 0 : index
    %c0_38 = arith.constant 0 : index
    %78 = vector.load %arg8[%c0_37, %c0_38] : memref<1x32xf32, #tpu.memory_space<vmem>>, vector<1x32xf32>
    %79 = vector.broadcast %78 : vector<1x32xf32> to vector<32x32xf32>
    %80 = arith.mulf %79, %77 : vector<32x32xf32>
    %81 = arith.addf %35, %80 : vector<32x32xf32>
    %82 = vector.shape_cast %81 : vector<32x32xf32> to vector<2x16x32xf32>
    %c0_39 = arith.constant 0 : index
    %c0_40 = arith.constant 0 : index
    %c0_41 = arith.constant 0 : index
    %83 = vector.load %arg13[%c0_39, %c0_40, %c0_41] : memref<2x16x32xf32, #tpu.memory_space<vmem>>, vector<2x16x32xf32>
    tpu.vector_store %arg13[%c0_39, %c0_40, %c0_41], %82 {strides = array<i32>} : memref<2x16x32xf32, #tpu.memory_space<vmem>>, vector<2x16x32xf32>,
    return
  }
  func.func @transform_0(%arg0: i32) -> (i32, i32, i32) {
    %c0_i32 = arith.constant 0 : i32
    %c0_i32_0 = arith.constant 0 : i32
    %c0_i32_1 = arith.constant 0 : i32
    return %arg0, %c0_i32, %c0_i32_0 : i32, i32, i32
  }
  func.func @transform_1(%arg0: i32) -> (i32, i32) {
    %c0_i32 = arith.constant 0 : i32
    %c0_i32_0 = arith.constant 0 : i32
    %c0_i32_1 = arith.constant 0 : i32
    return %c0_i32, %c0_i32_0 : i32, i32
  }
  func.func @transform_2(%arg0: i32) -> (i32, i32) {
    %c0_i32 = arith.constant 0 : i32
    %c0_i32_0 = arith.constant 0 : i32
    %c0_i32_1 = arith.constant 0 : i32
    return %c0_i32, %c0_i32_0 : i32, i32
  }
  func.func @transform_3(%arg0: i32) -> (i32, i32) {
    %c0_i32 = arith.constant 0 : i32
    %c0_i32_0 = arith.constant 0 : i32
    %c0_i32_1 = arith.constant 0 : i32
    return %c0_i32, %c0_i32_0 : i32, i32
  }
  func.func @transform_4(%arg0: i32) -> (i32, i32) {
    %c0_i32 = arith.constant 0 : i32
    %c0_i32_0 = arith.constant 0 : i32
    %c0_i32_1 = arith.constant 0 : i32
    return %c0_i32, %c0_i32_0 : i32, i32
  }
  func.func @transform_5(%arg0: i32) -> (i32, i32) {
    %c0_i32 = arith.constant 0 : i32
    %c0_i32_0 = arith.constant 0 : i32
    %c0_i32_1 = arith.constant 0 : i32
    return %c0_i32, %c0_i32_0 : i32, i32
  }
  func.func @transform_6(%arg0: i32) -> (i32, i32) {
    %c0_i32 = arith.constant 0 : i32
    %c0_i32_0 = arith.constant 0 : i32
    %c0_i32_1 = arith.constant 0 : i32
    return %c0_i32, %c0_i32_0 : i32, i32
  }
  func.func @transform_7(%arg0: i32) -> (i32, i32) {
    %c0_i32 = arith.constant 0 : i32
    %c0_i32_0 = arith.constant 0 : i32
    %c0_i32_1 = arith.constant 0 : i32
    return %c0_i32, %c0_i32_0 : i32, i32
  }
  func.func @transform_8(%arg0: i32) -> (i32, i32) {
    %c0_i32 = arith.constant 0 : i32
    %c0_i32_0 = arith.constant 0 : i32
    %c0_i32_1 = arith.constant 0 : i32
    return %c0_i32, %c0_i32_0 : i32, i32
  }
  func.func @transform_9(%arg0: i32) -> (i32, i32) {
    %c0_i32 = arith.constant 0 : i32
    %c0_i32_0 = arith.constant 0 : i32
    %c0_i32_1 = arith.constant 0 : i32
    return %c0_i32, %c0_i32_0 : i32, i32
  }
  func.func @transform_10(%arg0: i32) -> (i32, i32) {
    %c0_i32 = arith.constant 0 : i32
    %c0_i32_0 = arith.constant 0 : i32
    %c0_i32_1 = arith.constant 0 : i32
    return %c0_i32, %c0_i32_0 : i32, i32
  }
  func.func @transform_11(%arg0: i32) -> (i32, i32) {
    %c0_i32 = arith.constant 0 : i32
    %c0_i32_0 = arith.constant 0 : i32
    %c0_i32_1 = arith.constant 0 : i32
    return %c0_i32, %c0_i32_0 : i32, i32
  }
  func.func @transform_12(%arg0: i32) -> (i32, i32, i32) {
    %c0_i32 = arith.constant 0 : i32
    %c0_i32_0 = arith.constant 0 : i32
    %c0_i32_1 = arith.constant 0 : i32
    return %arg0, %c0_i32, %c0_i32_0 : i32, i32, i32
  }
}

module attributes {stable_mosaic.version = 11 : i64} {
  func.func @mlp_block_kernel(%arg0: i32, %arg1: memref<2x16x32xf32, #tpu.memory_space<vmem>>, %arg2: memref<16x16xbf16, #tpu.memory_space<vmem>>, %arg3: memref<1x32xf32, #tpu.memory_space<vmem>>, %arg4: memref<1x32xf32, #tpu.memory_space<vmem>>, %arg5: memref<1x32xf32, #tpu.memory_space<vmem>>, %arg6: memref<1x32xf32, #tpu.memory_space<vmem>>, %arg7: memref<1x32xf32, #tpu.memory_space<vmem>>, %arg8: memref<1x32xf32, #tpu.memory_space<vmem>>, %arg9: memref<32x128xbf16, #tpu.memory_space<vmem>>, %arg10: memref<1x128xf32, #tpu.memory_space<vmem>>, %arg11: memref<128x32xbf16, #tpu.memory_space<vmem>>, %arg12: memref<1x32xf32, #tpu.memory_space<vmem>>, %arg13: memref<2x16x32xf32, #tpu.memory_space<vmem>>) attributes {dimension_semantics = [#tpu.dimension_semantics<parallel>], iteration_bounds = array<i64: 1>, scalar_prefetch = 0 : i64, scratch_operands = 0 : i64, tpu.core_type = #tpu.core_type<tc>, window_params = [{transform_indices = @transform_0, window_bounds = array<i64: 2, 16, 32>}, {pipeline_mode = #tpu.pipeline_mode<synchronous>, transform_indices = @transform_1, window_bounds = array<i64: 16, 16>}, {pipeline_mode = #tpu.pipeline_mode<synchronous>, transform_indices = @transform_2, window_bounds = array<i64: 1, 32>}, {pipeline_mode = #tpu.pipeline_mode<synchronous>, transform_indices = @transform_3, window_bounds = array<i64: 1, 32>}, {pipeline_mode = #tpu.pipeline_mode<synchronous>, transform_indices = @transform_4, window_bounds = array<i64: 1, 32>}, {pipeline_mode = #tpu.pipeline_mode<synchronous>, transform_indices = @transform_5, window_bounds = array<i64: 1, 32>}, {pipeline_mode = #tpu.pipeline_mode<synchronous>, transform_indices = @transform_6, window_bounds = array<i64: 1, 32>}, {pipeline_mode = #tpu.pipeline_mode<synchronous>, transform_indices = @transform_7, window_bounds = array<i64: 1, 32>}, {pipeline_mode = #tpu.pipeline_mode<synchronous>, transform_indices = @transform_8, window_bounds = array<i64: 32, 128>}, {pipeline_mode = #tpu.pipeline_mode<synchronous>, transform_indices = @transform_9, window_bounds = array<i64: 1, 128>}, {pipeline_mode = #tpu.pipeline_mode<synchronous>, transform_indices = @transform_10, window_bounds = array<i64: 128, 32>}, {pipeline_mode = #tpu.pipeline_mode<synchronous>, transform_indices = @transform_11, window_bounds = array<i64: 1, 32>}, {transform_indices = @transform_12, window_bounds = array<i64: 2, 16, 32>}]} {
    %c0 = arith.constant 0 : index
    %c0_0 = arith.constant 0 : index
    %c0_1 = arith.constant 0 : index
    %0 = vector.load %arg1[%c0, %c0_0, %c0_1] : memref<2x16x32xf32, #tpu.memory_space<vmem>>, vector<2x16x32xf32>
    %c0_2 = arith.constant 0 : index
    %c0_3 = arith.constant 0 : index
    %1 = vector.load %arg3[%c0_2, %c0_3] : memref<1x32xf32, #tpu.memory_space<vmem>>, vector<1x32xf32>
    %c0_4 = arith.constant 0 : index
    %c0_5 = arith.constant 0 : index
    %2 = vector.load %arg4[%c0_4, %c0_5] : memref<1x32xf32, #tpu.memory_space<vmem>>, vector<1x32xf32>
    %cst = arith.constant dense<0.000000e+00> : vector<2x16xf32>
    %3 = vector.multi_reduction <add>, %0, %cst [2] : vector<2x16x32xf32> to vector<2x16xf32>
    %4 = vector.shape_cast %3 : vector<2x16xf32> to vector<2x16x1xf32>
    %cst_6 = arith.constant 3.200000e+01 : f32
    %5 = vector.broadcast %cst_6 : f32 to vector<2x16x1xf32>
    %6 = arith.divf %4, %5 : vector<2x16x1xf32>
    %7 = vector.broadcast %6 : vector<2x16x1xf32> to vector<2x16x32xf32>
    %8 = arith.subf %0, %7 : vector<2x16x32xf32>
    %9 = arith.mulf %8, %8 : vector<2x16x32xf32>
    %cst_7 = arith.constant dense<0.000000e+00> : vector<2x16xf32>
    %10 = vector.multi_reduction <add>, %9, %cst_7 [2] : vector<2x16x32xf32> to vector<2x16xf32>
    %11 = vector.shape_cast %10 : vector<2x16xf32> to vector<2x16x1xf32>
    %cst_8 = arith.constant 3.200000e+01 : f32
    %12 = vector.broadcast %cst_8 : f32 to vector<2x16x1xf32>
    %13 = arith.divf %11, %12 : vector<2x16x1xf32>
    %cst_9 = arith.constant 9.99999974E-6 : f32
    %14 = vector.broadcast %cst_9 : f32 to vector<2x16x1xf32>
    %15 = arith.addf %13, %14 : vector<2x16x1xf32>
    %16 = math.rsqrt %15 : vector<2x16x1xf32>
    %17 = vector.broadcast %16 : vector<2x16x1xf32> to vector<2x16x32xf32>
    %18 = arith.mulf %8, %17 : vector<2x16x32xf32>
    %19 = vector.shape_cast %1 : vector<1x32xf32> to vector<1x1x32xf32>
    %20 = vector.broadcast %19 : vector<1x1x32xf32> to vector<2x16x32xf32>
    %21 = arith.mulf %18, %20 : vector<2x16x32xf32>
    %22 = vector.shape_cast %2 : vector<1x32xf32> to vector<1x1x32xf32>
    %23 = vector.broadcast %22 : vector<1x1x32xf32> to vector<2x16x32xf32>
    %24 = arith.addf %21, %23 : vector<2x16x32xf32>
    %25 = arith.truncf %24 : vector<2x16x32xf32> to vector<2x16x32xbf16>
    %c0_10 = arith.constant 0 : index
    %c0_11 = arith.constant 0 : index
    %26 = vector.load %arg2[%c0_10, %c0_11] : memref<16x16xbf16, #tpu.memory_space<vmem>>, vector<16x16xbf16>
    %27 = vector.shape_cast %26 : vector<16x16xbf16> to vector<1x16x16xbf16>
    %28 = vector.broadcast %27 : vector<1x16x16xbf16> to vector<2x16x16xbf16>
    %cst_12 = arith.constant dense<0.000000e+00> : vector<2x16x32xf32>
    %29 = tpu.matmul %28, %25, %cst_12 {dimension_numbers = #tpu.dot_dimension_numbers<[2], [1], [1], [2], [0, 0, 0, 1, 1, 2], [0], [0]>} : vector<2x16x16xbf16>, vector<2x16x32xbf16>, vector<2x16x32xf32> -> vector<2x16x32xf32>
    %c0_13 = arith.constant 0 : index
    %c0_14 = arith.constant 0 : index
    %30 = vector.load %arg5[%c0_13, %c0_14] : memref<1x32xf32, #tpu.memory_space<vmem>>, vector<1x32xf32>
    %31 = vector.shape_cast %30 : vector<1x32xf32> to vector<1x1x32xf32>
    %32 = vector.broadcast %31 : vector<1x1x32xf32> to vector<2x16x32xf32>
    %33 = arith.mulf %32, %29 : vector<2x16x32xf32>
    %34 = arith.addf %0, %33 : vector<2x16x32xf32>
    %35 = vector.shape_cast %34 : vector<2x16x32xf32> to vector<32x32xf32>
    %c0_15 = arith.constant 0 : index
    %c0_16 = arith.constant 0 : index
    %36 = vector.load %arg6[%c0_15, %c0_16] : memref<1x32xf32, #tpu.memory_space<vmem>>, vector<1x32xf32>
    %c0_17 = arith.constant 0 : index
    %c0_18 = arith.constant 0 : index
    %37 = vector.load %arg7[%c0_17, %c0_18] : memref<1x32xf32, #tpu.memory_space<vmem>>, vector<1x32xf32>
    %cst_19 = arith.constant dense<0.000000e+00> : vector<32xf32>
    %38 = vector.multi_reduction <add>, %35, %cst_19 [1] : vector<32x32xf32> to vector<32xf32>
    %39 = vector.shape_cast %38 : vector<32xf32> to vector<32x1xf32>
    %cst_20 = arith.constant 3.200000e+01 : f32
    %40 = vector.broadcast %cst_20 : f32 to vector<32x1xf32>
    %41 = arith.divf %39, %40 : vector<32x1xf32>
    %42 = vector.broadcast %41 : vector<32x1xf32> to vector<32x32xf32>
    %43 = arith.subf %35, %42 : vector<32x32xf32>
    %44 = arith.mulf %43, %43 : vector<32x32xf32>
    %cst_21 = arith.constant dense<0.000000e+00> : vector<32xf32>
    %45 = vector.multi_reduction <add>, %44, %cst_21 [1] : vector<32x32xf32> to vector<32xf32>
    %46 = vector.shape_cast %45 : vector<32xf32> to vector<32x1xf32>
    %cst_22 = arith.constant 3.200000e+01 : f32
    %47 = vector.broadcast %cst_22 : f32 to vector<32x1xf32>
    %48 = arith.divf %46, %47 : vector<32x1xf32>
    %cst_23 = arith.constant 9.99999974E-6 : f32
    %49 = vector.broadcast %cst_23 : f32 to vector<32x1xf32>
    %50 = arith.addf %48, %49 : vector<32x1xf32>
    %51 = math.rsqrt %50 : vector<32x1xf32>
    %52 = vector.broadcast %51 : vector<32x1xf32> to vector<32x32xf32>
    %53 = arith.mulf %43, %52 : vector<32x32xf32>
    %54 = vector.broadcast %36 : vector<1x32xf32> to vector<32x32xf32>
    %55 = arith.mulf %53, %54 : vector<32x32xf32>
    %56 = vector.broadcast %37 : vector<1x32xf32> to vector<32x32xf32>
    %57 = arith.addf %55, %56 : vector<32x32xf32>
    %58 = arith.truncf %57 : vector<32x32xf32> to vector<32x32xbf16>
    %c0_24 = arith.constant 0 : index
    %c0_25 = arith.constant 0 : index
    %59 = vector.load %arg9[%c0_24, %c0_25] : memref<32x128xbf16, #tpu.memory_space<vmem>>, vector<32x128xbf16>
    %cst_26 = arith.constant dense<0.000000e+00> : vector<32x128xf32>
    %60 = tpu.matmul %58, %59, %cst_26 {dimension_numbers = #tpu.dot_dimension_numbers<[1], [0], [0], [1], [0, 0, 1, 1], [], []>} : vector<32x32xbf16>, vector<32x128xbf16>, vector<32x128xf32> -> vector<32x128xf32>
    %c0_27 = arith.constant 0 : index
    %c0_28 = arith.constant 0 : index
    %61 = vector.load %arg10[%c0_27, %c0_28] : memref<1x128xf32, #tpu.memory_space<vmem>>, vector<1x128xf32>
    %62 = vector.broadcast %61 : vector<1x128xf32> to vector<32x128xf32>
    %63 = arith.addf %60, %62 : vector<32x128xf32>
    %cst_29 = arith.constant 5.000000e-01 : f32
    %64 = vector.broadcast %cst_29 : f32 to vector<32x128xf32>
    %65 = arith.mulf %64, %63 : vector<32x128xf32>
    %cst_30 = arith.constant 0.707106769 : f32
    %66 = vector.broadcast %cst_30 : f32 to vector<32x128xf32>
    %67 = arith.mulf %63, %66 : vector<32x128xf32>
    %68 = math.erf %67 : vector<32x128xf32>
    %cst_31 = arith.constant 1.000000e+00 : f32
    %69 = vector.broadcast %cst_31 : f32 to vector<32x128xf32>
    %70 = arith.addf %69, %68 : vector<32x128xf32>
    %71 = arith.mulf %65, %70 : vector<32x128xf32>
    %72 = arith.truncf %71 : vector<32x128xf32> to vector<32x128xbf16>
    %c0_32 = arith.constant 0 : index
    %c0_33 = arith.constant 0 : index
    %73 = vector.load %arg11[%c0_32, %c0_33] : memref<128x32xbf16, #tpu.memory_space<vmem>>, vector<128x32xbf16>
    %cst_34 = arith.constant dense<0.000000e+00> : vector<32x32xf32>
    %74 = tpu.matmul %72, %73, %cst_34 {dimension_numbers = #tpu.dot_dimension_numbers<[1], [0], [0], [1], [0, 0, 1, 1], [], []>} : vector<32x128xbf16>, vector<128x32xbf16>, vector<32x32xf32> -> vector<32x32xf32>
    %c0_35 = arith.constant 0 : index
    %c0_36 = arith.constant 0 : index
    %75 = vector.load %arg12[%c0_35, %c0_36] : memref<1x32xf32, #tpu.memory_space<vmem>>, vector<1x32xf32>
    %76 = vector.broadcast %75 : vector<1x32xf32> to vector<32x32xf32>
    %77 = arith.addf %74, %76 : vector<32x32xf32>
    %c0_37 = arith.constant 0 : index
    %c0_38 = arith.constant 0 : index
    %78 = vector.load %arg8[%c0_37, %c0_38] : memref<1x32xf32, #tpu.memory_space<vmem>>, vector<1x32xf32>
    %79 = vector.broadcast %78 : vector<1x32xf32> to vector<32x32xf32>
    %80 = arith.mulf %79, %77 : vector<32x32xf32>
    %81 = arith.addf %35, %80 : vector<32x32xf32>
    %82 = vector.shape_cast %81 : vector<32x32xf32> to vector<2x16x32xf32>
    %c0_39 = arith.constant 0 : index
    %c0_40 = arith.constant 0 : index
    %c0_41 = arith.constant 0 : index
    %83 = vector.load %arg13[%c0_39, %c0_40, %c0_41] : memref<2x16x32xf32, #tpu.memory_space<vmem>>, vector<2x16x32xf32>
    tpu.vector_store %arg13[%c0_39, %c0_40, %c0_41], %82 {strides = array<i32>} : memref<2x16x32xf32, #tpu.memory_space<vmem>>, vector<2x16x32xf32>,
    return
  }
  func.func @transform_0(%arg0: i32) -> (i32, i32, i32) {
    %c0_i32 = arith.constant 0 : i32
    %c0_i32_0 = arith.constant 0 : i32
    %c0_i32_1 = arith.constant 0 : i32
    return %arg0, %c0_i32, %c0_i32_0 : i32, i32, i32
  }
  func.func @transform_1(%arg0: i32) -> (i32, i32) {
    %c0_i32 = arith.constant 0 : i32
    %c0_i32_0 = arith.constant 0 : i32
    %c0_i32_1 = arith.constant 0 : i32
    return %c0_i32, %c0_i32_0 : i32, i32
  }
  func.func @transform_2(%arg0: i32) -> (i32, i32) {
    %c0_i32 = arith.constant 0 : i32
    %c0_i32_0 = arith.constant 0 : i32
    %c0_i32_1 = arith.constant 0 : i32
    return %c0_i32, %c0_i32_0 : i32, i32
  }
  func.func @transform_3(%arg0: i32) -> (i32, i32) {
    %c0_i32 = arith.constant 0 : i32
    %c0_i32_0 = arith.constant 0 : i32
    %c0_i32_1 = arith.constant 0 : i32
    return %c0_i32, %c0_i32_0 : i32, i32
  }
  func.func @transform_4(%arg0: i32) -> (i32, i32) {
    %c0_i32 = arith.constant 0 : i32
    %c0_i32_0 = arith.constant 0 : i32
    %c0_i32_1 = arith.constant 0 : i32
    return %c0_i32, %c0_i32_0 : i32, i32
  }
  func.func @transform_5(%arg0: i32) -> (i32, i32) {
    %c0_i32 = arith.constant 0 : i32
    %c0_i32_0 = arith.constant 0 : i32
    %c0_i32_1 = arith.constant 0 : i32
    return %c0_i32, %c0_i32_0 : i32, i32
  }
  func.func @transform_6(%arg0: i32) -> (i32, i32) {
    %c0_i32 = arith.constant 0 : i32
    %c0_i32_0 = arith.constant 0 : i32
    %c0_i32_1 = arith.constant 0 : i32
    return %c0_i32, %c0_i32_0 : i32, i32
  }
  func.func @transform_7(%arg0: i32) -> (i32, i32) {
    %c0_i32 = arith.constant 0 : i32
    %c0_i32_0 = arith.constant 0 : i32
    %c0_i32_1 = arith.constant 0 : i32
    return %c0_i32, %c0_i32_0 : i32, i32
  }
  func.func @transform_8(%arg0: i32) -> (i32, i32) {
    %c0_i32 = arith.constant 0 : i32
    %c0_i32_0 = arith.constant 0 : i32
    %c0_i32_1 = arith.constant 0 : i32
    return %c0_i32, %c0_i32_0 : i32, i32
  }
  func.func @transform_9(%arg0: i32) -> (i32, i32) {
    %c0_i32 = arith.constant 0 : i32
    %c0_i32_0 = arith.constant 0 : i32
    %c0_i32_1 = arith.constant 0 : i32
    return %c0_i32, %c0_i32_0 : i32, i32
  }
  func.func @transform_10(%arg0: i32) -> (i32, i32) {
    %c0_i32 = arith.constant 0 : i32
    %c0_i32_0 = arith.constant 0 : i32
    %c0_i32_1 = arith.constant 0 : i32
    return %c0_i32, %c0_i32_0 : i32, i32
  }
  func.func @transform_11(%arg0: i32) -> (i32, i32) {
    %c0_i32 = arith.constant 0 : i32
    %c0_i32_0 = arith.constant 0 : i32
    %c0_i32_1 = arith.constant 0 : i32
    return %c0_i32, %c0_i32_0 : i32, i32
  }
  func.func @transform_12(%arg0: i32) -> (i32, i32, i32) {
    %c0_i32 = arith.constant 0 : i32
    %c0_i32_0 = arith.constant 0 : i32
    %c0_i32_1 = arith.constant 0 : i32
    return %arg0, %c0_i32, %c0_i32_0 : i32, i32, i32
  }
}

</mosaic_0001>

<bundles_post_ra>
// kernel: tpu_custom_call.1
= control target key start
LH: loop header
LB: loop body
LE: loop exit
PB: predicated region body
PF: predicated region fallthrough
CT: control target
= control target key end

     0   :  { %vm49_vm0 = vcmask 261120   ;;  %s924_s0 = inlined_call_operand.vmem [shape: f32[2,16,32], index: 0, kind: input, shape index: {}]   ;;  %s925_s1 = inlined_call_operand.vmem [shape: bf16[16,16], index: 1, kind: input, shape index: {}]   ;;  %s926_s2 = inlined_call_operand.vmem [shape: f32[1,32], index: 2, kind: input, shape index: {}]   ;;  %s927_s3 = inlined_call_operand.vmem [shape: f32[1,32], index: 3, kind: input, shape index: {}]   ;;  %s928_s4 = inlined_call_operand.vmem [shape: f32[1,32], index: 4, kind: input, shape index: {}]   ;;  %s929_s5 = inlined_call_operand.vmem [shape: f32[1,32], index: 5, kind: input, shape index: {}]   ;;  %s930_s6 = inlined_call_operand.vmem [shape: f32[1,32], index: 6, kind: input, shape index: {}]   ;;  %s931_s7 = inlined_call_operand.vmem [shape: f32[1,32], index: 7, kind: input, shape index: {}]   ;;  %s932_s8 = inlined_call_operand.vmem [shape: bf16[32,128], index: 8, kind: input, shape index: {}]   ;;  %s933_s9 = inlined_call_operand.vmem [shape: f32[1,128], index: 9, kind: input, shape index: {}]   ;;  %s934_s10 = inlined_call_operand.vmem [shape: bf16[128,32], index: 10, kind: input, shape index: {}]   ;;  %s935_s11 = inlined_call_operand.vmem [shape: f32[1,32], index: 11, kind: input, shape index: {}]   ;;  %s936_s12 = inlined_call_operand.hbm [shape: f32[2,16,32], index: 12, kind: output, shape index: {}]  }
   0x1   :  { %v782_v0 = vld [vmem:[%s924_s0] sm:$0xff]  ;;  %v787_v1 = vld [vmem:[%s924_s0 + $0x10] sm:$0xff]  ;;  %v792_v2 = vld [vmem:[%s924_s0 + $0x8] sm:$0xff] }
   0x2   :  { %v50_v3 = vsel %vm49_vm0, %v782_v0, 0.0  ;;  %v56_v4 = vsel %vm49_vm0, %v787_v1, 0.0  ;;  %v801_v5 = vld [vmem:[%s924_s0 + $0x18] sm:$0xff]  ;;  %v53_v6 = vsel %vm49_vm0, %v792_v2, 0.0 }
   0x3   :  { %51 = vadd.xlane.f32.xlu0 %v50_v3  ;;  %57 = vadd.xlane.f32.xlu1 %v56_v4  ;;  %v59_v7 = vsel %vm49_vm0, %v801_v5, 0.0 }
   0x7   :  { %54 = vadd.xlane.f32.xlu0 %v53_v6  ;;  %60 = vadd.xlane.f32.xlu1 %v59_v7 }
   0x8   :  { %17 = vsyncpa [#allocation3], 0  ;;  %v709_v28 = vmov 0.0   ;;  %vm710_vm1 = vmmov 0   ;;  %v564_v43 = vld [vmem:[%s926_s2] ss:$0 sm:$0xff] }
   0x9   :  { %605 = vmatprep.subr.bf16.mxu0 %v709_v28  ;;  %607 = vmatprep.mubr.msk.bf16.mxu0 %vm710_vm1, %v709_v28  ;;  %v565_v49 = vld [vmem:[%s927_s3] ss:$0 sm:$0xff]  ;;  %vm132_vm2 = vcmask 130048   ;;  %s711_s16 = smov [#allocation2]  }
   0xa   :  { %v650_v58 = vld [vmem:[%s925_s1] sm:$0xff]   ;;  %s553_s17 = sshll.u32 %s711_s16, 4  ;;  %s554_s17 = int_to_ptr.vmem [resolvable:$true] %s553_s17 }
   0xb   :  { %v569_v62 = vld [vmem:[%s928_s4] ss:$0 sm:$0xff]  ;;  %p690_p1 = scmp.lt.s32.totalorder %s554_s17, %s554_s17 }
  0x90   :  { %v52_v8 = vpop.xlane.xlu0 %51  ;;  %v58_v9 = vpop.xlane.xlu1 %57 }
  0x91   :  { %v63_v10 = vmul.f32 0.03125, %v52_v8  ;;  %v65_v11 = vmul.f32 0.03125, %v58_v9 }
  0x93   :  { %v67_v12 = vsub.f32 %v782_v0, %v63_v10  ;;  %v69_v13 = vsub.f32 %v787_v1, %v65_v11 }
  0x94   :  { %v55_v14 = vpop.xlane.xlu0 %54  ;;  %v61_v15 = vpop.xlane.xlu1 %60 }
  0x95   :  { %v64_v16 = vmul.f32 0.03125, %v55_v14  ;;  %v66_v17 = vmul.f32 0.03125, %v61_v15  ;;  %v71_v18 = vmul.f32 %v67_v12, %v67_v12  ;;  %v73_v19 = vmul.f32 %v69_v13, %v69_v13 }
  0x97   :  { %v68_v20 = vsub.f32 %v792_v2, %v64_v16  ;;  %v70_v21 = vsub.f32 %v801_v5, %v66_v17  ;;  %v75_v22 = vsel %vm49_vm0, %v71_v18, 0.0  ;;  %v81_v23 = vsel %vm49_vm0, %v73_v19, 0.0 }
  0x98   :  { %76 = vadd.xlane.f32.xlu0 %v75_v22 }
  0x99   :  { %v72_v24 = vmul.f32 %v68_v20, %v68_v20  ;;  %v74_v25 = vmul.f32 %v70_v21, %v70_v21 }
  0x9b   :  { %v78_v26 = vsel %vm49_vm0, %v72_v24, 0.0  ;;  %v84_v27 = vsel %vm49_vm0, %v74_v25, 0.0 }
  0x9c   :  { %82 = vadd.xlane.f32.xlu0 %v81_v23  ;;  %79 = vadd.xlane.f32.xlu1 %v78_v26 }
  0xa0   :  { %85 = vadd.xlane.f32.xlu1 %v84_v27 }
 0x125   :  { %v77_v29 = vpop.xlane.xlu0 %76 }
 0x126   :  { %v87_v30 = vmul.f32 0.03125, %v77_v29 }
 0x128   :  { %v91_v31 = vadd.f32 1e-05, %v87_v30 }
 0x129   :  { %v80_v32 = vpop.xlane.xlu1 %79  ;;  %v83_v33 = vpop.xlane.xlu0 %82 }
 0x12a   :  { %661 = vrsqrt.f32 %v91_v31  ;;  %v88_v34 = vmul.f32 0.03125, %v80_v32  ;;  %v89_v35 = vmul.f32 0.03125, %v83_v33 }
 0x12c   :  { %v92_v36 = vadd.f32 1e-05, %v88_v34  ;;  %v93_v37 = vadd.f32 1e-05, %v89_v35 }
 0x12d   :  { %v86_v38 = vpop.xlane.xlu1 %85 }
 0x12e   :  { %663 = vrsqrt.f32 %v92_v36  ;;  %v90_v39 = vmul.f32 0.03125, %v86_v38 }
 0x12f   :  { %665 = vrsqrt.f32 %v93_v37 }
 0x130   :  { %v94_v40 = vadd.f32 1e-05, %v90_v39  ;;  %v651_v39 = vld [vmem:[%s932_s8] sm:$0xff]  }
 0x132   :  { %667 = vrsqrt.f32 %v94_v40  ;;  %v652_v40 = vld [vmem:[%s932_s8 + $0x8] sm:$0xff]  }
 0x134   :  { %v662_v41 = vpop.eup %661 }
 0x135   :  { %v99_v42 = vmul.f32 %v662_v41, %v67_v12  ;;  %v653_v41 = vld [vmem:[%s934_s10] sm:$0xff]  }
 0x136   :  { %625 = vmatprep.subr.bf16.mxu1 %v653_v41 }
 0x137   :  { %v109_v47 = vmul.f32 %v564_v43, %v99_v42  ;;  %v654_v42 = vld [vmem:[%s934_s10 + $0x8] sm:$0xff]   ;;  %626 = vmatpush3.bf16.msra.mxu1 %v653_v41 }
 0x138   :  { %v664_v44 = vpop.eup %663  ;;  %627 = vmatprep.subr.bf16.mxu1 %v654_v42 }
 0x139   :  { %v666_v45 = vpop.eup %665  ;;  %v100_v46 = vmul.f32 %v664_v44, %v68_v20  ;;  %v119_v53 = vadd.f32 %v565_v49, %v109_v47 }
 0x13a   :  { %v101_v48 = vmul.f32 %v666_v45, %v69_v13 }
 0x13b   :  { %v110_v50 = vmul.f32 %v564_v43, %v100_v46  ;;  %628 = vmatpush3.bf16.msra.mxu1 %v654_v42 }
 0x13c   :  { %v668_v51 = vpop.eup %667  ;;  %v111_v55 = vmul.f32 %v564_v43, %v101_v48 }
 0x13d   :  { %v102_v52 = vmul.f32 %v668_v51, %v70_v21  ;;  %v120_v54 = vadd.f32 %v565_v49, %v110_v50 }
 0x13e   :  { %v121_v59 = vadd.f32 %v565_v49, %v111_v55 }
 0x13f   :  { %v123_v56 = vpack.c.bf16 %v120_v54, %v119_v53  ;;  %v112_v57 = vmul.f32 %v564_v43, %v102_v52 }
 0x141   :  { %606 = vmatpush3.bf16.msra.mxu0 %v123_v56  ;;  %v122_v60 = vadd.f32 %v565_v49, %v112_v57  ;;  %v570_v56 = vld [vmem:[%s929_s5] ss:$0 sm:$0xff] }
 0x142   :  { %611 = vmatprep.subr.bf16.mxu0 %v709_v28 }
 0x143   :  { %v124_v61 = vpack.c.bf16 %v122_v60, %v121_v59 }
 0x144   :  { %608 = vmatmul.mubr.msk.bf16.vlgmr.msra.gmra.mrb[0].mxu0 %vm132_vm2, %v650_v58 }
 0x145   :  { %612 = vmatpush3.bf16.msra.mxu0 %v124_v61  ;;  %613 = vmatprep.mubr.msk.bf16.mxu0 %vm710_vm1, %v709_v28  ;;  %v571_v61 = vld [vmem:[%s930_s6] ss:$0 sm:$0xff] }
 0x146   :  { %617 = vmatprep.subr.bf16.mxu0 %v651_v39 }
 0x14c   :  { %614 = vmatmul.mubr.msk.bf16.vlgmr.msra.gmra.mrb[4].mxu0 %vm132_vm2, %v650_v58 }
 0x14d   :  { %618 = vmatpush3.bf16.msra.mxu0 %v651_v39 }
 0x14e   :  { %619 = vmatprep.subr.bf16.mxu0 %v652_v40 }
 0x151   :  { %620 = vmatpush3.bf16.msra.mxu0 %v652_v40 }
 0x217   :  { %v170_v63 = vpop.f32.mrb[0].mxu0 }
 0x218   :  { %v225_v3 = vmul.f32 %v569_v62, %v170_v63  ;;  %v609_v4 = vpop.f32.mrb[1].mxu0 }
 0x219   :  { %v173_v6 = vpop.f32.mrb[2].mxu0 }
 0x21a   :  { %v830_v7 = vadd.f32 %v225_v3, %v782_v0  ;;  %v226_v8 = vmul.f32 %v569_v62, %v173_v6  ;;  %v610_v9 = vpop.f32.mrb[3].mxu0 }
 0x21c   :  { %v833_v10 = vadd.f32 %v226_v8, %v792_v2  ;;  %v235_v11 = vsel %vm49_vm0, %v830_v7, 0.0 }
 0x21d   :  { %236 = vadd.xlane.f32.xlu0 %v235_v11 }
 0x21e   :  { %v238_v12 = vsel %vm49_vm0, %v833_v10, 0.0 }
 0x21f   :  { %239 = vadd.xlane.f32.xlu1 %v238_v12  ;;  %v211_v13 = vpop.f32.mrb[4].mxu0 }
 0x220   :  { %v227_v14 = vmul.f32 %v569_v62, %v211_v13  ;;  %v615_v15 = vpop.f32.mrb[5].mxu0 }
 0x221   :  { %v214_v16 = vpop.f32.mrb[6].mxu0 }
 0x222   :  { %v840_v0 = vadd.f32 %v227_v14, %v787_v1  ;;  %v228_v17 = vmul.f32 %v569_v62, %v214_v16  ;;  %v616_v18 = vpop.f32.mrb[7].mxu0 }
 0x223   :  { %v656_v18 = vld [vmem:[%s934_s10 + $0x18] sm:$0xff]  }
 0x224   :  { %v843_v2 = vadd.f32 %v228_v17, %v801_v5  ;;  %v241_v19 = vsel %vm49_vm0, %v840_v0, 0.0  ;;  %v655_v17 = vld [vmem:[%s934_s10 + $0x10] sm:$0xff]  }
 0x225   :  { %242 = vadd.xlane.f32.xlu0 %v241_v19  ;;  %629 = vmatprep.subr.bf16.mxu1 %v655_v17  ;;  %v657_v19 = vld [vmem:[%s934_s10 + $0x20] sm:$0xff]  }
 0x226   :  { %v244_v20 = vsel %vm49_vm0, %v843_v2, 0.0  ;;  %630 = vmatpush3.bf16.msra.mxu1 %v655_v17 }
 0x227   :  { %245 = vadd.xlane.f32.xlu1 %v244_v20  ;;  %631 = vmatprep.subr.bf16.mxu1 %v656_v18  ;;  %v658_v20 = vld [vmem:[%s934_s10 + $0x28] sm:$0xff]  }
 0x22a   :  { %632 = vmatpush3.bf16.msra.mxu1 %v656_v18 }
 0x22b   :  { %633 = vmatprep.subr.bf16.mxu1 %v657_v19 }
 0x22e   :  { %634 = vmatpush3.bf16.msra.mxu1 %v657_v19 }
 0x22f   :  { %635 = vmatprep.subr.bf16.mxu1 %v658_v20 }
 0x232   :  { %636 = vmatpush3.bf16.msra.mxu1 %v658_v20 }
 0x2aa   :  { %v237_v21 = vpop.xlane.xlu0 %236 }
 0x2ab   :  { %v247_v22 = vmul.f32 0.03125, %v237_v21  ;;  %v659_v21 = vld [vmem:[%s934_s10 + $0x30] sm:$0xff]  }
 0x2ac   :  { %v240_v23 = vpop.xlane.xlu1 %239  ;;  %637 = vmatprep.subr.bf16.mxu1 %v659_v21 }
 0x2ad   :  { %v251_v24 = vsub.f32 %v830_v7, %v247_v22  ;;  %v248_v1 = vmul.f32 0.03125, %v240_v23  ;;  %638 = vmatpush3.bf16.msra.mxu1 %v659_v21  ;;  %v660_v22 = vld [vmem:[%s934_s10 + $0x38] sm:$0xff]   ;;  %v572_v23 = vld [vmem:[%s933_s9] ss:$0 sm:$0xff] }
 0x2ae   :  { %639 = vmatprep.subr.bf16.mxu1 %v660_v22 }
 0x2af   :  { %v252_v25 = vsub.f32 %v833_v10, %v248_v1  ;;  %v255_v26 = vmul.f32 %v251_v24, %v251_v24 }
 0x2b1   :  { %v259_v5 = vsel %vm49_vm0, %v255_v26, 0.0  ;;  %v256_v27 = vmul.f32 %v252_v25, %v252_v25  ;;  %640 = vmatpush3.bf16.msra.mxu1 %v660_v22 }
 0x2b2   :  { %260 = vadd.xlane.f32.xlu0 %v259_v5  ;;  %v243_v28 = vpop.xlane.xlu0 %242 }
 0x2b3   :  { %v249_v29 = vmul.f32 0.03125, %v243_v28  ;;  %v262_v30 = vsel %vm49_vm0, %v256_v27, 0.0 }
 0x2b4   :  { %263 = vadd.xlane.f32.xlu1 %v262_v30  ;;  %v246_v31 = vpop.xlane.xlu1 %245 }
 0x2b5   :  { %v253_v32 = vsub.f32 %v840_v0, %v249_v29  ;;  %v250_v33 = vmul.f32 0.03125, %v246_v31 }
 0x2b7   :  { %v254_v34 = vsub.f32 %v843_v2, %v250_v33  ;;  %v257_v35 = vmul.f32 %v253_v32, %v253_v32 }
 0x2b9   :  { %v265_v36 = vsel %vm49_vm0, %v257_v35, 0.0  ;;  %v258_v37 = vmul.f32 %v254_v34, %v254_v34 }
 0x2ba   :  { %266 = vadd.xlane.f32.xlu0 %v265_v36 }
 0x2bb   :  { %v268_v38 = vsel %vm49_vm0, %v258_v37, 0.0 }
 0x2bc   :  { %269 = vadd.xlane.f32.xlu1 %v268_v38 }
 0x33f   :  { %v261_v43 = vpop.xlane.xlu0 %260 }
 0x340   :  { %v271_v44 = vmul.f32 0.03125, %v261_v43 }
 0x341   :  { %v264_v45 = vpop.xlane.xlu1 %263 }
 0x342   :  { %v275_v46 = vadd.f32 1e-05, %v271_v44  ;;  %v272_v47 = vmul.f32 0.03125, %v264_v45 }
 0x344   :  { %669 = vrsqrt.f32 %v275_v46  ;;  %v276_v48 = vadd.f32 1e-05, %v272_v47 }
 0x346   :  { %671 = vrsqrt.f32 %v276_v48 }
 0x347   :  { %v267_v49 = vpop.xlane.xlu0 %266 }
 0x348   :  { %v273_v50 = vmul.f32 0.03125, %v267_v49 }
 0x349   :  { %v270_v51 = vpop.xlane.xlu1 %269 }
 0x34a   :  { %v277_v52 = vadd.f32 1e-05, %v273_v50  ;;  %v274_v53 = vmul.f32 0.03125, %v270_v51 }
 0x34c   :  { %673 = vrsqrt.f32 %v277_v52  ;;  %v278_v54 = vadd.f32 1e-05, %v274_v53  ;;  %v577_v52 = vld [vmem:[%s935_s11] ss:$0 sm:$0xff] }
 0x34e   :  { %v670_v55 = vpop.eup %669  ;;  %675 = vrsqrt.f32 %v278_v54  ;;  %v586_v54 = vld [vmem:[%s931_s7] ss:$0 sm:$0xff]  ;;  %s685_s7 = scalar_lea.vmem %s554_s17, 512 }
 0x34f   :  { %v283_v57 = vmul.f32 %v670_v55, %v251_v24  ;;  %p686_p0 = scmp.ne.s32.totalorder %s554_s17, %s685_s7  ;;  %p691_p2 = scmp.lt.s32.totalorder %s685_s7, %s685_s7 }
 0x350   :  { %v672_v58 = vpop.eup %671 }
 0x351   :  { %v284_v59 = vmul.f32 %v672_v58, %v252_v25  ;;  %v293_v60 = vmul.f32 %v570_v56, %v283_v57  ;;  %p692_p3 = por %p691_p2, %p690_p1 }
 0x353   :  { %v294_v62 = vmul.f32 %v570_v56, %v284_v59  ;;  %v303_v63 = vadd.f32 %v571_v61, %v293_v60  ;;  %p693_p4 = pnand %p692_p3, %p686_p0 }
 0x355   :  { %v304_v3 = vadd.f32 %v571_v61, %v294_v62 }
 0x356   :  { %v674_v4 = vpop.eup %673 }
 0x357   :  { %v285_v6 = vmul.f32 %v674_v4, %v253_v32  ;;  %v307_v8 = vpack.c.bf16 %v304_v3, %v303_v63 }
 0x358   :  { %v676_v9 = vpop.eup %675 }
 0x359   :  { %v295_v11 = vmul.f32 %v570_v56, %v285_v6  ;;  %v286_v12 = vmul.f32 %v676_v9, %v254_v34  ;;  %621 = vmatprep.mubr.msk.bf16.mxu0 %vm49_vm0, %v307_v8 }
 0x35b   :  { %v296_v13 = vmul.f32 %v570_v56, %v286_v12  ;;  %v305_v14 = vadd.f32 %v571_v61, %v295_v11 }
 0x35d   :  { %v306_v15 = vadd.f32 %v571_v61, %v296_v13 }
 0x35f   :  { %v308_v16 = vpack.c.bf16 %v306_v15, %v305_v14 }
 0x361   :  { %622 = vmatmul.mubr.msk.bf16.vlgmr.msra.gmra.mrb[8].mxu0 %vm49_vm0, %v308_v16 }
 0x434   :  { %v623_v24 = vpop.f32.mrb[8].mxu0 }
 0x435   :  { %v381_v1 = vadd.f32 %v623_v24, %v572_v23  ;;  %v372_v25 = vpop.f32.mrb[9].mxu0 }
 0x436   :  { %v373_v26 = vadd.f32 %v572_v23, %v372_v25  ;;  %v624_v5 = vpop.f32.mrb[10].mxu0 }
 0x437   :  { %v393_v27 = vmul.f32 0.70710677, %v381_v1  ;;  %v384_v28 = vadd.f32 %v624_v5, %v572_v23  ;;  %v375_v29 = vpop.f32.mrb[11].mxu0  ;;  %v389_v40 = vmul.f32 0.5, %v381_v1 }
 0x438   :  { %v391_v30 = vmul.f32 0.70710677, %v373_v26  ;;  %v376_v31 = vadd.f32 %v572_v23, %v375_v29  ;;  %v387_v43 = vmul.f32 0.5, %v373_v26 }
 0x439   :  { %677 = verf.f32 %v393_v27  ;;  %v394_v32 = vmul.f32 0.70710677, %v384_v28  ;;  %v390_v41 = vmul.f32 0.5, %v384_v28 }
 0x43a   :  { %679 = verf.f32 %v391_v30  ;;  %v392_v33 = vmul.f32 0.70710677, %v376_v31  ;;  %v388_v44 = vmul.f32 0.5, %v376_v31 }
 0x43b   :  { %681 = verf.f32 %v394_v32 }
 0x43c   :  { %683 = verf.f32 %v392_v33 }
 0x443   :  { %v678_v34 = vpop.eup %677 }
 0x444   :  { %v680_v35 = vpop.eup %679  ;;  %v401_v36 = vadd.f32 1.0, %v678_v34 }
 0x445   :  { %v682_v37 = vpop.eup %681  ;;  %v399_v38 = vadd.f32 1.0, %v680_v35 }
 0x446   :  { %v684_v39 = vpop.eup %683  ;;  %v402_v42 = vadd.f32 1.0, %v682_v37  ;;  %v405_v46 = vmul.f32 %v401_v36, %v389_v40 }
 0x447   :  { %v400_v45 = vadd.f32 1.0, %v684_v39  ;;  %v403_v48 = vmul.f32 %v399_v38, %v387_v43 }
 0x448   :  { %v406_v47 = vmul.f32 %v402_v42, %v390_v41 }
 0x449   :  { %v404_v49 = vmul.f32 %v400_v45, %v388_v44 }
 0x44a   :  { %v408_v50 = vpack.c.bf16 %v406_v47, %v405_v46 }
 0x44b   :  { %v407_v51 = vpack.c.bf16 %v404_v49, %v403_v48 }
 0x44d   :  { %641 = vmatprep.mubr.bf16.mxu1 %v407_v51 }
 0x44e   :  { %642 = vmatmul.mubr.bf16.vlgmr.msra.gmra.mrb[0].mxu1 %v408_v50 }
 0x521   :  { %v643_v53 = vpop.f32.mrb[0].mxu1 }
 0x522   :  { %v523_v55 = vadd.f32 %v643_v53, %v577_v52  ;;  %v514_v56 = vpop.f32.mrb[1].mxu1 }
 0x523   :  { %v515_v57 = vadd.f32 %v577_v52, %v514_v56  ;;  %v644_v58 = vpop.f32.mrb[2].mxu1 }
 0x524   :  { %v538_v59 = vmul.f32 %v586_v54, %v523_v55  ;;  %v526_v60 = vadd.f32 %v644_v58, %v577_v52  ;;  %v517_v61 = vpop.f32.mrb[3].mxu1 }
 0x525   :  { %v536_v62 = vmul.f32 %v586_v54, %v515_v57  ;;  %v518_v63 = vadd.f32 %v577_v52, %v517_v61 }
 0x526   :  { %v542_v3 = vadd.f32 %v538_v59, %v840_v0  ;;  %v539_v4 = vmul.f32 %v586_v54, %v526_v60 }
 0x527   :  { %v540_v6 = vadd.f32 %v536_v62, %v830_v7  ;;  %v537_v8 = vmul.f32 %v586_v54, %v518_v63 }
 0x528   :  { %546 = vst.msk [vmem:[#allocation2 + $0x10] sm:$0xff] %vm49_vm0, %v542_v3  ;;  %v543_v9 = vadd.f32 %v539_v4, %v843_v2 }
 0x529   :  { %544 = vst.msk [vmem:[#allocation2] sm:$0xff] %vm49_vm0, %v540_v6  ;;  %v541_v11 = vadd.f32 %v537_v8, %v833_v10 }
 0x52a   :  { %547 = vst.msk [vmem:[#allocation2 + $0x18] sm:$0xff] %vm49_vm0, %v543_v9 }
 0x52b   :  { %545 = vst.msk [vmem:[#allocation2 + $0x8] sm:$0xff] %vm49_vm0, %v541_v11 }
 0x52c   :  { %696 = shalt.err (!%p693_p4)
}
 0x52d   :  { %s697_s19 = scalar_lea.hbm %s936_s12, 512 }
 0x52e   :  { %p698_p5 = scmp.ne.s32.totalorder %s936_s12, %s697_s19  ;;  %p701_p6 = scmp.lt.u32.totalorder %s697_s19, %s936_s12 }
 0x530   :  { %p703_p7 = pnand %p701_p6, %p698_p5 }
 0x532   :  { %706 = shalt.err (!%p703_p7)
}
 0x533   :  { %s712_s23 = smov 128   ;;  %s713_s24 = smov 8  }
 0x534   :  { %559 = dma.vmem_to_hbm [thread:$0]  %s554_s17, 512, %s936_s12, [#allocation3], %s712_s23, %s712_s23, %s713_s24  }
 0x535   :  { %707 = dma.done.wait [#allocation3], 512  }
 0x536   :  { %708 = vsyncadd [#allocation3], 4294966784 }
 0x537   :  { %563 = vsyncpa [#allocation3], 1 }

// kernel: tpu_custom_call.1
= control target key start
LH: loop header
LB: loop body
LE: loop exit
PB: predicated region body
PF: predicated region fallthrough
CT: control target
= control target key end

     0   :  { %vm49_vm0 = vcmask 261120   ;;  %s924_s0 = inlined_call_operand.vmem [shape: f32[2,16,32], index: 0, kind: input, shape index: {}]   ;;  %s925_s1 = inlined_call_operand.vmem [shape: bf16[16,16], index: 1, kind: input, shape index: {}]   ;;  %s926_s2 = inlined_call_operand.vmem [shape: f32[1,32], index: 2, kind: input, shape index: {}]   ;;  %s927_s3 = inlined_call_operand.vmem [shape: f32[1,32], index: 3, kind: input, shape index: {}]   ;;  %s928_s4 = inlined_call_operand.vmem [shape: f32[1,32], index: 4, kind: input, shape index: {}]   ;;  %s929_s5 = inlined_call_operand.vmem [shape: f32[1,32], index: 5, kind: input, shape index: {}]   ;;  %s930_s6 = inlined_call_operand.vmem [shape: f32[1,32], index: 6, kind: input, shape index: {}]   ;;  %s931_s7 = inlined_call_operand.vmem [shape: f32[1,32], index: 7, kind: input, shape index: {}]   ;;  %s932_s8 = inlined_call_operand.vmem [shape: bf16[32,128], index: 8, kind: input, shape index: {}]   ;;  %s933_s9 = inlined_call_operand.vmem [shape: f32[1,128], index: 9, kind: input, shape index: {}]   ;;  %s934_s10 = inlined_call_operand.vmem [shape: bf16[128,32], index: 10, kind: input, shape index: {}]   ;;  %s935_s11 = inlined_call_operand.vmem [shape: f32[1,32], index: 11, kind: input, shape index: {}]   ;;  %s936_s12 = inlined_call_operand.hbm [shape: f32[2,16,32], index: 12, kind: output, shape index: {}]  }
   0x1   :  { %v782_v0 = vld [vmem:[%s924_s0] sm:$0xff]  ;;  %v787_v1 = vld [vmem:[%s924_s0 + $0x10] sm:$0xff]  ;;  %v792_v2 = vld [vmem:[%s924_s0 + $0x8] sm:$0xff] }
   0x2   :  { %v50_v3 = vsel %vm49_vm0, %v782_v0, 0.0  ;;  %v56_v4 = vsel %vm49_vm0, %v787_v1, 0.0  ;;  %v801_v5 = vld [vmem:[%s924_s0 + $0x18] sm:$0xff]  ;;  %v53_v6 = vsel %vm49_vm0, %v792_v2, 0.0 }
   0x3   :  { %51 = vadd.xlane.f32.xlu0 %v50_v3  ;;  %57 = vadd.xlane.f32.xlu1 %v56_v4  ;;  %v59_v7 = vsel %vm49_vm0, %v801_v5, 0.0 }
   0x7   :  { %54 = vadd.xlane.f32.xlu0 %v53_v6  ;;  %60 = vadd.xlane.f32.xlu1 %v59_v7 }
   0x8   :  { %17 = vsyncpa [#allocation3], 0  ;;  %v709_v28 = vmov 0.0   ;;  %vm710_vm1 = vmmov 0   ;;  %v564_v43 = vld [vmem:[%s926_s2] ss:$0 sm:$0xff] }
   0x9   :  { %605 = vmatprep.subr.bf16.mxu0 %v709_v28  ;;  %607 = vmatprep.mubr.msk.bf16.mxu0 %vm710_vm1, %v709_v28  ;;  %v565_v49 = vld [vmem:[%s927_s3] ss:$0 sm:$0xff]  ;;  %vm132_vm2 = vcmask 130048   ;;  %s711_s16 = smov [#allocation2]  }
   0xa   :  { %v650_v58 = vld [vmem:[%s925_s1] sm:$0xff]   ;;  %s553_s17 = sshll.u32 %s711_s16, 4  ;;  %s554_s17 = int_to_ptr.vmem [resolvable:$true] %s553_s17 }
   0xb   :  { %v569_v62 = vld [vmem:[%s928_s4] ss:$0 sm:$0xff]  ;;  %p690_p1 = scmp.lt.s32.totalorder %s554_s17, %s554_s17 }
  0x90   :  { %v52_v8 = vpop.xlane.xlu0 %51  ;;  %v58_v9 = vpop.xlane.xlu1 %57 }
  0x91   :  { %v63_v10 = vmul.f32 0.03125, %v52_v8  ;;  %v65_v11 = vmul.f32 0.03125, %v58_v9 }
  0x93   :  { %v67_v12 = vsub.f32 %v782_v0, %v63_v10  ;;  %v69_v13 = vsub.f32 %v787_v1, %v65_v11 }
  0x94   :  { %v55_v14 = vpop.xlane.xlu0 %54  ;;  %v61_v15 = vpop.xlane.xlu1 %60 }
  0x95   :  { %v64_v16 = vmul.f32 0.03125, %v55_v14  ;;  %v66_v17 = vmul.f32 0.03125, %v61_v15  ;;  %v71_v18 = vmul.f32 %v67_v12, %v67_v12  ;;  %v73_v19 = vmul.f32 %v69_v13, %v69_v13 }
  0x97   :  { %v68_v20 = vsub.f32 %v792_v2, %v64_v16  ;;  %v70_v21 = vsub.f32 %v801_v5, %v66_v17  ;;  %v75_v22 = vsel %vm49_vm0, %v71_v18, 0.0  ;;  %v81_v23 = vsel %vm49_vm0, %v73_v19, 0.0 }
  0x98   :  { %76 = vadd.xlane.f32.xlu0 %v75_v22 }
  0x99   :  { %v72_v24 = vmul.f32 %v68_v20, %v68_v20  ;;  %v74_v25 = vmul.f32 %v70_v21, %v70_v21 }
  0x9b   :  { %v78_v26 = vsel %vm49_vm0, %v72_v24, 0.0  ;;  %v84_v27 = vsel %vm49_vm0, %v74_v25, 0.0 }
  0x9c   :  { %82 = vadd.xlane.f32.xlu0 %v81_v23  ;;  %79 = vadd.xlane.f32.xlu1 %v78_v26 }
  0xa0   :  { %85 = vadd.xlane.f32.xlu1 %v84_v27 }
 0x125   :  { %v77_v29 = vpop.xlane.xlu0 %76 }
 0x126   :  { %v87_v30 = vmul.f32 0.03125, %v77_v29 }
 0x128   :  { %v91_v31 = vadd.f32 1e-05, %v87_v30 }
 0x129   :  { %v80_v32 = vpop.xlane.xlu1 %79  ;;  %v83_v33 = vpop.xlane.xlu0 %82 }
 0x12a   :  { %661 = vrsqrt.f32 %v91_v31  ;;  %v88_v34 = vmul.f32 0.03125, %v80_v32  ;;  %v89_v35 = vmul.f32 0.03125, %v83_v33 }
 0x12c   :  { %v92_v36 = vadd.f32 1e-05, %v88_v34  ;;  %v93_v37 = vadd.f32 1e-05, %v89_v35 }
 0x12d   :  { %v86_v38 = vpop.xlane.xlu1 %85 }
 0x12e   :  { %663 = vrsqrt.f32 %v92_v36  ;;  %v90_v39 = vmul.f32 0.03125, %v86_v38 }
 0x12f   :  { %665 = vrsqrt.f32 %v93_v37 }
 0x130   :  { %v94_v40 = vadd.f32 1e-05, %v90_v39  ;;  %v651_v39 = vld [vmem:[%s932_s8] sm:$0xff]  }
 0x132   :  { %667 = vrsqrt.f32 %v94_v40  ;;  %v652_v40 = vld [vmem:[%s932_s8 + $0x8] sm:$0xff]  }
 0x134   :  { %v662_v41 = vpop.eup %661 }
 0x135   :  { %v99_v42 = vmul.f32 %v662_v41, %v67_v12  ;;  %v653_v41 = vld [vmem:[%s934_s10] sm:$0xff]  }
 0x136   :  { %625 = vmatprep.subr.bf16.mxu1 %v653_v41 }
 0x137   :  { %v109_v47 = vmul.f32 %v564_v43, %v99_v42  ;;  %v654_v42 = vld [vmem:[%s934_s10 + $0x8] sm:$0xff]   ;;  %626 = vmatpush3.bf16.msra.mxu1 %v653_v41 }
 0x138   :  { %v664_v44 = vpop.eup %663  ;;  %627 = vmatprep.subr.bf16.mxu1 %v654_v42 }
 0x139   :  { %v666_v45 = vpop.eup %665  ;;  %v100_v46 = vmul.f32 %v664_v44, %v68_v20  ;;  %v119_v53 = vadd.f32 %v565_v49, %v109_v47 }
 0x13a   :  { %v101_v48 = vmul.f32 %v666_v45, %v69_v13 }
 0x13b   :  { %v110_v50 = vmul.f32 %v564_v43, %v100_v46  ;;  %628 = vmatpush3.bf16.msra.mxu1 %v654_v42 }
 0x13c   :  { %v668_v51 = vpop.eup %667  ;;  %v111_v55 = vmul.f32 %v564_v43, %v101_v48 }
 0x13d   :  { %v102_v52 = vmul.f32 %v668_v51, %v70_v21  ;;  %v120_v54 = vadd.f32 %v565_v49, %v110_v50 }
 0x13e   :  { %v121_v59 = vadd.f32 %v565_v49, %v111_v55 }
 0x13f   :  { %v123_v56 = vpack.c.bf16 %v120_v54, %v119_v53  ;;  %v112_v57 = vmul.f32 %v564_v43, %v102_v52 }
 0x141   :  { %606 = vmatpush3.bf16.msra.mxu0 %v123_v56  ;;  %v122_v60 = vadd.f32 %v565_v49, %v112_v57  ;;  %v570_v56 = vld [vmem:[%s929_s5] ss:$0 sm:$0xff] }
 0x142   :  { %611 = vmatprep.subr.bf16.mxu0 %v709_v28 }
 0x143   :  { %v124_v61 = vpack.c.bf16 %v122_v60, %v121_v59 }
 0x144   :  { %608 = vmatmul.mubr.msk.bf16.vlgmr.msra.gmra.mrb[0].mxu0 %vm132_vm2, %v650_v58 }
 0x145   :  { %612 = vmatpush3.bf16.msra.mxu0 %v124_v61  ;;  %613 = vmatprep.mubr.msk.bf16.mxu0 %vm710_vm1, %v709_v28  ;;  %v571_v61 = vld [vmem:[%s930_s6] ss:$0 sm:$0xff] }
 0x146   :  { %617 = vmatprep.subr.bf16.mxu0 %v651_v39 }
 0x14c   :  { %614 = vmatmul.mubr.msk.bf16.vlgmr.msra.gmra.mrb[4].mxu0 %vm132_vm2, %v650_v58 }
 0x14d   :  { %618 = vmatpush3.bf16.msra.mxu0 %v651_v39 }
 0x14e   :  { %619 = vmatprep.subr.bf16.mxu0 %v652_v40 }
 0x151   :  { %620 = vmatpush3.bf16.msra.mxu0 %v652_v40 }
 0x217   :  { %v170_v63 = vpop.f32.mrb[0].mxu0 }
 0x218   :  { %v225_v3 = vmul.f32 %v569_v62, %v170_v63  ;;  %v609_v4 = vpop.f32.mrb[1].mxu0 }
 0x219   :  { %v173_v6 = vpop.f32.mrb[2].mxu0 }
 0x21a   :  { %v830_v7 = vadd.f32 %v225_v3, %v782_v0  ;;  %v226_v8 = vmul.f32 %v569_v62, %v173_v6  ;;  %v610_v9 = vpop.f32.mrb[3].mxu0 }
 0x21c   :  { %v833_v10 = vadd.f32 %v226_v8, %v792_v2  ;;  %v235_v11 = vsel %vm49_vm0, %v830_v7, 0.0 }
 0x21d   :  { %236 = vadd.xlane.f32.xlu0 %v235_v11 }
 0x21e   :  { %v238_v12 = vsel %vm49_vm0, %v833_v10, 0.0 }
 0x21f   :  { %239 = vadd.xlane.f32.xlu1 %v238_v12  ;;  %v211_v13 = vpop.f32.mrb[4].mxu0 }
 0x220   :  { %v227_v14 = vmul.f32 %v569_v62, %v211_v13  ;;  %v615_v15 = vpop.f32.mrb[5].mxu0 }
 0x221   :  { %v214_v16 = vpop.f32.mrb[6].mxu0 }
 0x222   :  { %v840_v0 = vadd.f32 %v227_v14, %v787_v1  ;;  %v228_v17 = vmul.f32 %v569_v62, %v214_v16  ;;  %v616_v18 = vpop.f32.mrb[7].mxu0 }
 0x223   :  { %v656_v18 = vld [vmem:[%s934_s10 + $0x18] sm:$0xff]  }
 0x224   :  { %v843_v2 = vadd.f32 %v228_v17, %v801_v5  ;;  %v241_v19 = vsel %vm49_vm0, %v840_v0, 0.0  ;;  %v655_v17 = vld [vmem:[%s934_s10 + $0x10] sm:$0xff]  }
 0x225   :  { %242 = vadd.xlane.f32.xlu0 %v241_v19  ;;  %629 = vmatprep.subr.bf16.mxu1 %v655_v17  ;;  %v657_v19 = vld [vmem:[%s934_s10 + $0x20] sm:$0xff]  }
 0x226   :  { %v244_v20 = vsel %vm49_vm0, %v843_v2, 0.0  ;;  %630 = vmatpush3.bf16.msra.mxu1 %v655_v17 }
 0x227   :  { %245 = vadd.xlane.f32.xlu1 %v244_v20  ;;  %631 = vmatprep.subr.bf16.mxu1 %v656_v18  ;;  %v658_v20 = vld [vmem:[%s934_s10 + $0x28] sm:$0xff]  }
 0x22a   :  { %632 = vmatpush3.bf16.msra.mxu1 %v656_v18 }
 0x22b   :  { %633 = vmatprep.subr.bf16.mxu1 %v657_v19 }
 0x22e   :  { %634 = vmatpush3.bf16.msra.mxu1 %v657_v19 }
 0x22f   :  { %635 = vmatprep.subr.bf16.mxu1 %v658_v20 }
 0x232   :  { %636 = vmatpush3.bf16.msra.mxu1 %v658_v20 }
 0x2aa   :  { %v237_v21 = vpop.xlane.xlu0 %236 }
 0x2ab   :  { %v247_v22 = vmul.f32 0.03125, %v237_v21  ;;  %v659_v21 = vld [vmem:[%s934_s10 + $0x30] sm:$0xff]  }
 0x2ac   :  { %v240_v23 = vpop.xlane.xlu1 %239  ;;  %637 = vmatprep.subr.bf16.mxu1 %v659_v21 }
 0x2ad   :  { %v251_v24 = vsub.f32 %v830_v7, %v247_v22  ;;  %v248_v1 = vmul.f32 0.03125, %v240_v23  ;;  %638 = vmatpush3.bf16.msra.mxu1 %v659_v21  ;;  %v660_v22 = vld [vmem:[%s934_s10 + $0x38] sm:$0xff]   ;;  %v572_v23 = vld [vmem:[%s933_s9] ss:$0 sm:$0xff] }
 0x2ae   :  { %639 = vmatprep.subr.bf16.mxu1 %v660_v22 }
 0x2af   :  { %v252_v25 = vsub.f32 %v833_v10, %v248_v1  ;;  %v255_v26 = vmul.f32 %v251_v24, %v251_v24 }
 0x2b1   :  { %v259_v5 = vsel %vm49_vm0, %v255_v26, 0.0  ;;  %v256_v27 = vmul.f32 %v252_v25, %v252_v25  ;;  %640 = vmatpush3.bf16.msra.mxu1 %v660_v22 }
 0x2b2   :  { %260 = vadd.xlane.f32.xlu0 %v259_v5  ;;  %v243_v28 = vpop.xlane.xlu0 %242 }
 0x2b3   :  { %v249_v29 = vmul.f32 0.03125, %v243_v28  ;;  %v262_v30 = vsel %vm49_vm0, %v256_v27, 0.0 }
 0x2b4   :  { %263 = vadd.xlane.f32.xlu1 %v262_v30  ;;  %v246_v31 = vpop.xlane.xlu1 %245 }
 0x2b5   :  { %v253_v32 = vsub.f32 %v840_v0, %v249_v29  ;;  %v250_v33 = vmul.f32 0.03125, %v246_v31 }
 0x2b7   :  { %v254_v34 = vsub.f32 %v843_v2, %v250_v33  ;;  %v257_v35 = vmul.f32 %v253_v32, %v253_v32 }
 0x2b9   :  { %v265_v36 = vsel %vm49_vm0, %v257_v35, 0.0  ;;  %v258_v37 = vmul.f32 %v254_v34, %v254_v34 }
 0x2ba   :  { %266 = vadd.xlane.f32.xlu0 %v265_v36 }
 0x2bb   :  { %v268_v38 = vsel %vm49_vm0, %v258_v37, 0.0 }
 0x2bc   :  { %269 = vadd.xlane.f32.xlu1 %v268_v38 }
 0x33f   :  { %v261_v43 = vpop.xlane.xlu0 %260 }
 0x340   :  { %v271_v44 = vmul.f32 0.03125, %v261_v43 }
 0x341   :  { %v264_v45 = vpop.xlane.xlu1 %263 }
 0x342   :  { %v275_v46 = vadd.f32 1e-05, %v271_v44  ;;  %v272_v47 = vmul.f32 0.03125, %v264_v45 }
 0x344   :  { %669 = vrsqrt.f32 %v275_v46  ;;  %v276_v48 = vadd.f32 1e-05, %v272_v47 }
 0x346   :  { %671 = vrsqrt.f32 %v276_v48 }
 0x347   :  { %v267_v49 = vpop.xlane.xlu0 %266 }
 0x348   :  { %v273_v50 = vmul.f32 0.03125, %v267_v49 }
 0x349   :  { %v270_v51 = vpop.xlane.xlu1 %269 }
 0x34a   :  { %v277_v52 = vadd.f32 1e-05, %v273_v50  ;;  %v274_v53 = vmul.f32 0.03125, %v270_v51 }
 0x34c   :  { %673 = vrsqrt.f32 %v277_v52  ;;  %v278_v54 = vadd.f32 1e-05, %v274_v53  ;;  %v577_v52 = vld [vmem:[%s935_s11] ss:$0 sm:$0xff] }
 0x34e   :  { %v670_v55 = vpop.eup %669  ;;  %675 = vrsqrt.f32 %v278_v54  ;;  %v586_v54 = vld [vmem:[%s931_s7] ss:$0 sm:$0xff]  ;;  %s685_s7 = scalar_lea.vmem %s554_s17, 512 }
 0x34f   :  { %v283_v57 = vmul.f32 %v670_v55, %v251_v24  ;;  %p686_p0 = scmp.ne.s32.totalorder %s554_s17, %s685_s7  ;;  %p691_p2 = scmp.lt.s32.totalorder %s685_s7, %s685_s7 }
 0x350   :  { %v672_v58 = vpop.eup %671 }
 0x351   :  { %v284_v59 = vmul.f32 %v672_v58, %v252_v25  ;;  %v293_v60 = vmul.f32 %v570_v56, %v283_v57  ;;  %p692_p3 = por %p691_p2, %p690_p1 }
 0x353   :  { %v294_v62 = vmul.f32 %v570_v56, %v284_v59  ;;  %v303_v63 = vadd.f32 %v571_v61, %v293_v60  ;;  %p693_p4 = pnand %p692_p3, %p686_p0 }
 0x355   :  { %v304_v3 = vadd.f32 %v571_v61, %v294_v62 }
 0x356   :  { %v674_v4 = vpop.eup %673 }
 0x357   :  { %v285_v6 = vmul.f32 %v674_v4, %v253_v32  ;;  %v307_v8 = vpack.c.bf16 %v304_v3, %v303_v63 }
 0x358   :  { %v676_v9 = vpop.eup %675 }
 0x359   :  { %v295_v11 = vmul.f32 %v570_v56, %v285_v6  ;;  %v286_v12 = vmul.f32 %v676_v9, %v254_v34  ;;  %621 = vmatprep.mubr.msk.bf16.mxu0 %vm49_vm0, %v307_v8 }
 0x35b   :  { %v296_v13 = vmul.f32 %v570_v56, %v286_v12  ;;  %v305_v14 = vadd.f32 %v571_v61, %v295_v11 }
 0x35d   :  { %v306_v15 = vadd.f32 %v571_v61, %v296_v13 }
 0x35f   :  { %v308_v16 = vpack.c.bf16 %v306_v15, %v305_v14 }
 0x361   :  { %622 = vmatmul.mubr.msk.bf16.vlgmr.msra.gmra.mrb[8].mxu0 %vm49_vm0, %v308_v16 }
 0x434   :  { %v623_v24 = vpop.f32.mrb[8].mxu0 }
 0x435   :  { %v381_v1 = vadd.f32 %v623_v24, %v572_v23  ;;  %v372_v25 = vpop.f32.mrb[9].mxu0 }
 0x436   :  { %v373_v26 = vadd.f32 %v572_v23, %v372_v25  ;;  %v624_v5 = vpop.f32.mrb[10].mxu0 }
 0x437   :  { %v393_v27 = vmul.f32 0.70710677, %v381_v1  ;;  %v384_v28 = vadd.f32 %v624_v5, %v572_v23  ;;  %v375_v29 = vpop.f32.mrb[11].mxu0  ;;  %v389_v40 = vmul.f32 0.5, %v381_v1 }
 0x438   :  { %v391_v30 = vmul.f32 0.70710677, %v373_v26  ;;  %v376_v31 = vadd.f32 %v572_v23, %v375_v29  ;;  %v387_v43 = vmul.f32 0.5, %v373_v26 }
 0x439   :  { %677 = verf.f32 %v393_v27  ;;  %v394_v32 = vmul.f32 0.70710677, %v384_v28  ;;  %v390_v41 = vmul.f32 0.5, %v384_v28 }
 0x43a   :  { %679 = verf.f32 %v391_v30  ;;  %v392_v33 = vmul.f32 0.70710677, %v376_v31  ;;  %v388_v44 = vmul.f32 0.5, %v376_v31 }
 0x43b   :  { %681 = verf.f32 %v394_v32 }
 0x43c   :  { %683 = verf.f32 %v392_v33 }
 0x443   :  { %v678_v34 = vpop.eup %677 }
 0x444   :  { %v680_v35 = vpop.eup %679  ;;  %v401_v36 = vadd.f32 1.0, %v678_v34 }
 0x445   :  { %v682_v37 = vpop.eup %681  ;;  %v399_v38 = vadd.f32 1.0, %v680_v35 }
 0x446   :  { %v684_v39 = vpop.eup %683  ;;  %v402_v42 = vadd.f32 1.0, %v682_v37  ;;  %v405_v46 = vmul.f32 %v401_v36, %v389_v40 }
 0x447   :  { %v400_v45 = vadd.f32 1.0, %v684_v39  ;;  %v403_v48 = vmul.f32 %v399_v38, %v387_v43 }
 0x448   :  { %v406_v47 = vmul.f32 %v402_v42, %v390_v41 }
 0x449   :  { %v404_v49 = vmul.f32 %v400_v45, %v388_v44 }
 0x44a   :  { %v408_v50 = vpack.c.bf16 %v406_v47, %v405_v46 }
 0x44b   :  { %v407_v51 = vpack.c.bf16 %v404_v49, %v403_v48 }
 0x44d   :  { %641 = vmatprep.mubr.bf16.mxu1 %v407_v51 }
 0x44e   :  { %642 = vmatmul.mubr.bf16.vlgmr.msra.gmra.mrb[0].mxu1 %v408_v50 }
 0x521   :  { %v643_v53 = vpop.f32.mrb[0].mxu1 }
 0x522   :  { %v523_v55 = vadd.f32 %v643_v53, %v577_v52  ;;  %v514_v56 = vpop.f32.mrb[1].mxu1 }
 0x523   :  { %v515_v57 = vadd.f32 %v577_v52, %v514_v56  ;;  %v644_v58 = vpop.f32.mrb[2].mxu1 }
 0x524   :  { %v538_v59 = vmul.f32 %v586_v54, %v523_v55  ;;  %v526_v60 = vadd.f32 %v644_v58, %v577_v52  ;;  %v517_v61 = vpop.f32.mrb[3].mxu1 }
 0x525   :  { %v536_v62 = vmul.f32 %v586_v54, %v515_v57  ;;  %v518_v63 = vadd.f32 %v577_v52, %v517_v61 }
 0x526   :  { %v542_v3 = vadd.f32 %v538_v59, %v840_v0  ;;  %v539_v4 = vmul.f32 %v586_v54, %v526_v60 }
 0x527   :  { %v540_v6 = vadd.f32 %v536_v62, %v830_v7  ;;  %v537_v8 = vmul.f32 %v586_v54, %v518_v63 }
 0x528   :  { %546 = vst.msk [vmem:[#allocation2 + $0x10] sm:$0xff] %vm49_vm0, %v542_v3  ;;  %v543_v9 = vadd.f32 %v539_v4, %v843_v2 }
 0x529   :  { %544 = vst.msk [vmem:[#allocation2] sm:$0xff] %vm49_vm0, %v540_v6  ;;  %v541_v11 = vadd.f32 %v537_v8, %v833_v10 }
 0x52a   :  { %547 = vst.msk [vmem:[#allocation2 + $0x18] sm:$0xff] %vm49_vm0, %v543_v9 }
 0x52b   :  { %545 = vst.msk [vmem:[#allocation2 + $0x8] sm:$0xff] %vm49_vm0, %v541_v11 }
 0x52c   :  { %696 = shalt.err (!%p693_p4)
}
 0x52d   :  { %s697_s19 = scalar_lea.hbm %s936_s12, 512 }
 0x52e   :  { %p698_p5 = scmp.ne.s32.totalorder %s936_s12, %s697_s19  ;;  %p701_p6 = scmp.lt.u32.totalorder %s697_s19, %s936_s12 }
 0x530   :  { %p703_p7 = pnand %p701_p6, %p698_p5 }
 0x532   :  { %706 = shalt.err (!%p703_p7)
}
 0x533   :  { %s712_s23 = smov 128   ;;  %s713_s24 = smov 8  }
 0x534   :  { %559 = dma.vmem_to_hbm [thread:$0]  %s554_s17, 512, %s936_s12, [#allocation3], %s712_s23, %s712_s23, %s713_s24  }
 0x535   :  { %707 = dma.done.wait [#allocation3], 512  }
 0x536   :  { %708 = vsyncadd [#allocation3], 4294966784 }
 0x537   :  { %563 = vsyncpa [#allocation3], 1 }

</bundles_post_ra>
